<compile_context>
chip_gen: v6e
topology: v6e:2x2x1
jax: 0.10.0
libtpu: 0.0.40
codegen_flags: <defaults>
</compile_context>

<pallas_src>
import jax
import jax.numpy as jnp
from jax.experimental import pallas as pl
from jax.experimental.pallas import tpu as pltpu

_LANE = 128
_SUBLANE = 8

# Resolved on first call: does the installed Pallas accept pl.Buffered(1)
# on constant-index-map weight BlockSpecs?
_BUFFERED_WEIGHTS_OK = None


def _round_up(x, n):
    return ((x + n - 1) // n) * n


# --------------------------------------------------------------------------
# Kernel
# --------------------------------------------------------------------------
def _transition_kernel(s_ref, w1_ref, b1_ref, w2_ref, b2_ref, w3_ref, b3_ref,
                       o_ref):
    """One row-tile of the 3-layer MLP transition with residual add.

    s_ref: [tile_m, c]           (native channel width, any float dtype)
    w1:    [c, c_pad]  bf16      (zero-padded output cols)
    w2:    [c_pad, c_pad] bf16
    w3:    [c_pad, c]  bf16      (zero-padded input rows)
    b1,b2: [1, c_pad]  f32       b3: [1, c] f32
    """
    # linear_1 + ReLU  (bf16 MXU operands, f32 accumulation, f32 VPU math)
    x = jnp.dot(s_ref[...].astype(jnp.bfloat16), w1_ref[...],
                preferred_element_type=jnp.float32)
    x = jnp.maximum(x + b1_ref[...], 0.0)

    # linear_2 + ReLU
    x = jnp.dot(x.astype(jnp.bfloat16), w2_ref[...],
                preferred_element_type=jnp.float32)
    x = jnp.maximum(x + b2_ref[...], 0.0)

    # linear_3 + residual (re-read the input ref here: no f32 residual copy
    # kept live across the three matmuls)
    x = jnp.dot(x.astype(jnp.bfloat16), w3_ref[...],
                preferred_element_type=jnp.float32)
    x = x + b3_ref[...] + s_ref[...].astype(jnp.float32)

    o_ref[...] = x.astype(o_ref.dtype)


# --------------------------------------------------------------------------
# Parameter prep (do ONCE, reuse across calls)
# --------------------------------------------------------------------------
def prepare_params(params, c=None):
    """One-time weight prep: bf16 cast + 128-lane zero-pad. Idempotent.

    Accepts w1,w2,w3 of shape [c, c] stored as [c_in, c_out] (transposed vs.
    PyTorch's [c_out, c_in]) and b1,b2,b3 of shape [c] or [1, c].
    """
    if isinstance(params, dict) and params.get("_prepared", False):
        return params
    w1 = jnp.asarray(params["w1"])
    if c is None:
        c = w1.shape[0]
    c_pad = _round_up(c, _LANE)
    pc = c_pad - c

    def _b(b, pad):
        b = jnp.asarray(b).reshape(1, c).astype(jnp.float32)
        return jnp.pad(b, ((0, 0), (0, pad))) if pad else b

    return {
        "_prepared": True,
        "c": c,
        # bf16-native MXU operands on v5e/v6e/v7x; zero padding keeps the
        # math exact (padded lanes stay 0 and never reach the output).
        "w1": jnp.pad(w1, ((0, 0), (0, pc))).astype(jnp.bfloat16),
        "w2": jnp.pad(jnp.asarray(params["w2"]),
                      ((0, pc), (0, pc))).astype(jnp.bfloat16),
        "w3": jnp.pad(jnp.asarray(params["w3"]),
                      ((0, pc), (0, 0))).astype(jnp.bfloat16),
        "b1": _b(params["b1"], pc),
        "b2": _b(params["b2"], pc),
        "b3": _b(params["b3"], 0),
    }


# --------------------------------------------------------------------------
# Tiling / VMEM heuristics
# --------------------------------------------------------------------------
def _vmem_config():
    """(vmem_limit_bytes, live-VMEM budget) by TPU generation."""
    try:
        cap = pltpu.get_tpu_info().vmem_capacity_bytes
    except Exception:
        cap = 64 << 20                       # conservative (v7x physical)
    if cap >= (100 << 20):                   # v5e / v6e: 128 MiB physical
        return 64 << 20, 48 << 20
    return 32 << 20, 20 << 20                # v7x: 64 MiB physical


def _choose_tile_m(m, c, c_pad, itemsize, budget, align):
    """Row tile: fits the live-VMEM budget (pipeline buffers + weights +
    in-kernel f32/bf16 intermediates), multiple of `align` sublanes, and
    gives >= 4 grid steps when possible (>= 2 per TensorCore on v7x)."""
    # weights/biases, counted double-buffered even though we request Buffered(1)
    weight_bytes = 2 * (2 * (c * c_pad + c_pad * c_pad + c_pad * c)
                        + 4 * (2 * c_pad + c))
    # double-buffered in/out row tiles + f32 intermediates + bf16 cast temps
    per_row = 4 * c * itemsize + 16 * c_pad
    cap_rows = max(align, (budget - weight_bytes) // per_row)
    tile = min(1024, (cap_rows // align) * align)
    tile = min(tile, _round_up(m, align))          # never exceed the slab
    if m > align:
        tile = min(tile, _round_up(pl.cdiv(m, 4), align))
    return max(align, tile)


# --------------------------------------------------------------------------
# pallas_call wrapper
# --------------------------------------------------------------------------
def _call_kernel(s2d, p, tile_m, grid, vmem_limit, cost, use_buffered):
    c = p["c"]
    c_pad = p["w2"].shape[0]
    kw = {"pipeline_mode": pl.Buffered(buffer_count=1)} if use_buffered else {}

    row_spec = pl.BlockSpec((tile_m, c), lambda i: (i, 0))
    w1_spec = pl.BlockSpec((c, c_pad), lambda i: (0, 0), **kw)
    w2_spec = pl.BlockSpec((c_pad, c_pad), lambda i: (0, 0), **kw)
    w3_spec = pl.BlockSpec((c_pad, c), lambda i: (0, 0), **kw)
    b_wide = pl.BlockSpec((1, c_pad), lambda i: (0, 0), **kw)
    b_narrow = pl.BlockSpec((1, c), lambda i: (0, 0), **kw)

    return pl.pallas_call(
        _transition_kernel,
        out_shape=jax.ShapeDtypeStruct(s2d.shape, s2d.dtype),
        grid_spec=pltpu.PrefetchScalarGridSpec(
            num_scalar_prefetch=0,
            grid=grid,
            in_specs=[
                row_spec,            # s tile
                w1_spec, b_wide,     # linear_1
                w2_spec, b_wide,     # linear_2
                w3_spec, b_narrow,   # linear_3
            ],
            out_specs=row_spec,
        ),
        compiler_params=pltpu.CompilerParams(
            dimension_semantics=("parallel",),
            vmem_limit_bytes=vmem_limit,
        ),
        cost_estimate=cost,
    )(s2d, p["w1"], p["b1"], p["w2"], p["b2"], p["w3"], p["b3"])


def structure_module_transition_layer(s, params, *, tile_m=None):
    """Apply StructureModuleTransitionLayer.forward via a Pallas TPU kernel.

    s:      [..., c] float array (f32 or bf16)
    params: raw param dict (see prepare_params) or an already-prepared dict.
    """
    global _BUFFERED_WEIGHTS_OK
    p = prepare_params(params)
    c = p["c"]
    c_pad = p["w2"].shape[0]
    orig_shape = s.shape
    assert orig_shape[-1] == c, "channel dim mismatch with params"

    s2d = s.reshape(-1, c)
    m = s2d.shape[0]
    itemsize = jnp.dtype(s.dtype).itemsize
    align = max(_SUBLANE, 32 // itemsize)   # 8 for f32, 16 for bf16

    vmem_limit, budget = _vmem_config()
    if tile_m is None:
        tile_m = _choose_tile_m(m, c, c_pad, itemsize, budget, align)
    assert tile_m % align == 0, f"tile_m must be a multiple of {align}"

    grid = (pl.cdiv(m, tile_m),)            # partial last block is masked
    cost = pl.CostEstimate(
        flops=2 * m * (c * c_pad + c_pad * c_pad + c_pad * c),
        transcendentals=0,
        bytes_accessed=(2 * m * c * itemsize
                        + 2 * (c * c_pad + c_pad * c_pad + c_pad * c)
                        + 4 * (2 * c_pad + c)),
    )

    args = (s2d, p, tile_m, grid, vmem_limit, cost)
    if _BUFFERED_WEIGHTS_OK is None:
        try:
            out = jax.block_until_ready(_call_kernel(*args, use_buffered=True))
            _BUFFERED_WEIGHTS_OK = True
        except Exception:
            _BUFFERED_WEIGHTS_OK = False
            out = _call_kernel(*args, use_buffered=False)
    else:
        out = _call_kernel(*args, use_buffered=_BUFFERED_WEIGHTS_OK)

    return out.reshape(orig_shape)


# --------------------------------------------------------------------------
# Reference + test harness
# --------------------------------------------------------------------------
def init_params(key, c, dtype=jnp.float32):
    """Synthetic params matching the module's shapes (weights stored [c_in, c_out])."""
    k1, k2 = jax.random.split(key, 2)
    he_std = (2.0 / c) ** 0.5
    return {
        "w1": jax.random.normal(k1, (c, c), dtype) * he_std,
        "b1": jnp.zeros((1, c), dtype),
        "w2": jax.random.normal(k2, (c, c), dtype) * he_std,
        "b2": jnp.zeros((1, c), dtype),
        "w3": jnp.zeros((c, c), dtype),       # 'final' init: zero weights
        "b3": jnp.zeros((1, c), dtype),
    }


def reference_forward(s, p):
    """Pure-JAX f32 reference reproducing the PyTorch forward exactly."""
    x = jnp.maximum(s @ p["w1"] + jnp.asarray(p["b1"]).reshape(-1), 0.0)
    x = jnp.maximum(x @ p["w2"] + jnp.asarray(p["b2"]).reshape(-1), 0.0)
    x = x @ p["w3"] + jnp.asarray(p["b3"]).reshape(-1)
    return x + s


def _run_case(key, batch, n_res, c, dtype=jnp.float32, atol=5e-2, rtol=5e-2):
    k_s, k_p, k_w3 = jax.random.split(key, 3)
    s = jax.random.normal(k_s, (batch, n_res, c), jnp.float32).astype(dtype)

    raw = init_params(k_p, c)
    # True 'final' (zero) init makes linear_3 output 0 (layer == identity);
    # perturb w3/b3 so the full kernel path is exercised.
    raw["w3"] = 0.05 * jax.random.normal(k_w3, (c, c), jnp.float32)
    raw["b3"] = 0.01 * jnp.ones((1, c), jnp.float32)

    prepped = prepare_params(raw)            # weight cast/pad done ONCE
    out = structure_module_transition_layer(s, prepped)
    out = jax.block_until_ready(out)

    ref = reference_forward(s.astype(jnp.float32), raw)
    assert out.shape == s.shape and out.dtype == s.dtype
    err = float(jnp.max(jnp.abs(out.astype(jnp.float32) - ref)))
    assert jnp.allclose(out.astype(jnp.float32), ref, atol=atol, rtol=rtol), err


if __name__ == "__main__":
    key = jax.random.PRNGKey(0)
    k1, k2, k3 = jax.random.split(key, 3)

    # Lane-dense c (multiple of 128); M=36 -> tile 16, grid 3 with a masked
    # partial last row-block (no wrapper-side row padding / slicing).
    _run_case(k1, batch=2, n_res=18, c=128)

    # Small channel (c=32): only the KiB-scale weights are padded to 128
    # lanes; the activation slab stays at native width in HBM.
    _run_case(k2, batch=2, n_res=8, c=32)

    # bf16 activation I/O path at the typical c=384 (halves in/out HBM bytes;
    # accumulation and bias/ReLU/residual math stay f32 inside the kernel).
    _run_case(k3, batch=2, n_res=12, c=384, dtype=jnp.bfloat16,
              atol=2e-1, rtol=1e-1)

    print("KERNEL_OK")
</pallas_src>

<mosaic_0001>
module attributes {stable_mosaic.version = 11 : i64} {
  func.func @_transition_kernel(%arg0: i32, %arg1: memref<16x128xf32, #tpu.memory_space<vmem>>, %arg2: memref<128x128xbf16, #tpu.memory_space<vmem>>, %arg3: memref<1x128xf32, #tpu.memory_space<vmem>>, %arg4: memref<128x128xbf16, #tpu.memory_space<vmem>>, %arg5: memref<1x128xf32, #tpu.memory_space<vmem>>, %arg6: memref<128x128xbf16, #tpu.memory_space<vmem>>, %arg7: memref<1x128xf32, #tpu.memory_space<vmem>>, %arg8: memref<16x128xf32, #tpu.memory_space<vmem>>) attributes {dimension_semantics = [#tpu.dimension_semantics<parallel>], iteration_bounds = array<i64: 3>, scalar_prefetch = 0 : i64, scratch_operands = 0 : i64, tpu.core_type = #tpu.core_type<tc>, window_params = [{transform_indices = @transform_0, window_bounds = array<i64: 16, 128>}, {pipeline_mode = #tpu.pipeline_mode<synchronous>, transform_indices = @transform_1, window_bounds = array<i64: 128, 128>}, {pipeline_mode = #tpu.pipeline_mode<synchronous>, transform_indices = @transform_2, window_bounds = array<i64: 1, 128>}, {pipeline_mode = #tpu.pipeline_mode<synchronous>, transform_indices = @transform_3, window_bounds = array<i64: 128, 128>}, {pipeline_mode = #tpu.pipeline_mode<synchronous>, transform_indices = @transform_4, window_bounds = array<i64: 1, 128>}, {pipeline_mode = #tpu.pipeline_mode<synchronous>, transform_indices = @transform_5, window_bounds = array<i64: 128, 128>}, {pipeline_mode = #tpu.pipeline_mode<synchronous>, transform_indices = @transform_6, window_bounds = array<i64: 1, 128>}, {transform_indices = @transform_7, window_bounds = array<i64: 16, 128>}]} {
    %c0 = arith.constant 0 : index
    %c0_0 = arith.constant 0 : index
    %0 = vector.load %arg1[%c0, %c0_0] : memref<16x128xf32, #tpu.memory_space<vmem>>, vector<16x128xf32>
    %1 = arith.truncf %0 : vector<16x128xf32> to vector<16x128xbf16>
    %c0_1 = arith.constant 0 : index
    %c0_2 = arith.constant 0 : index
    %2 = vector.load %arg2[%c0_1, %c0_2] : memref<128x128xbf16, #tpu.memory_space<vmem>>, vector<128x128xbf16>
    %cst = arith.constant dense<0.000000e+00> : vector<16x128xf32>
    %3 = tpu.matmul %1, %2, %cst {dimension_numbers = #tpu.dot_dimension_numbers<[1], [0], [0], [1], [0, 0, 1, 1], [], []>} : vector<16x128xbf16>, vector<128x128xbf16>, vector<16x128xf32> -> vector<16x128xf32>
    %c0_3 = arith.constant 0 : index
    %c0_4 = arith.constant 0 : index
    %4 = vector.load %arg3[%c0_3, %c0_4] : memref<1x128xf32, #tpu.memory_space<vmem>>, vector<1x128xf32>
    %5 = vector.broadcast %4 : vector<1x128xf32> to vector<16x128xf32>
    %6 = arith.addf %3, %5 : vector<16x128xf32>
    %cst_5 = arith.constant 0.000000e+00 : f32
    %7 = vector.broadcast %cst_5 : f32 to vector<16x128xf32>
    %8 = arith.maximumf %6, %7 : vector<16x128xf32>
    %9 = arith.truncf %8 : vector<16x128xf32> to vector<16x128xbf16>
    %c0_6 = arith.constant 0 : index
    %c0_7 = arith.constant 0 : index
    %10 = vector.load %arg4[%c0_6, %c0_7] : memref<128x128xbf16, #tpu.memory_space<vmem>>, vector<128x128xbf16>
    %cst_8 = arith.constant dense<0.000000e+00> : vector<16x128xf32>
    %11 = tpu.matmul %9, %10, %cst_8 {dimension_numbers = #tpu.dot_dimension_numbers<[1], [0], [0], [1], [0, 0, 1, 1], [], []>} : vector<16x128xbf16>, vector<128x128xbf16>, vector<16x128xf32> -> vector<16x128xf32>
    %c0_9 = arith.constant 0 : index
    %c0_10 = arith.constant 0 : index
    %12 = vector.load %arg5[%c0_9, %c0_10] : memref<1x128xf32, #tpu.memory_space<vmem>>, vector<1x128xf32>
    %13 = vector.broadcast %12 : vector<1x128xf32> to vector<16x128xf32>
    %14 = arith.addf %11, %13 : vector<16x128xf32>
    %cst_11 = arith.constant 0.000000e+00 : f32
    %15 = vector.broadcast %cst_11 : f32 to vector<16x128xf32>
    %16 = arith.maximumf %14, %15 : vector<16x128xf32>
    %17 = arith.truncf %16 : vector<16x128xf32> to vector<16x128xbf16>
    %c0_12 = arith.constant 0 : index
    %c0_13 = arith.constant 0 : index
    %18 = vector.load %arg6[%c0_12, %c0_13] : memref<128x128xbf16, #tpu.memory_space<vmem>>, vector<128x128xbf16>
    %cst_14 = arith.constant dense<0.000000e+00> : vector<16x128xf32>
    %19 = tpu.matmul %17, %18, %cst_14 {dimension_numbers = #tpu.dot_dimension_numbers<[1], [0], [0], [1], [0, 0, 1, 1], [], []>} : vector<16x128xbf16>, vector<128x128xbf16>, vector<16x128xf32> -> vector<16x128xf32>
    %c0_15 = arith.constant 0 : index
    %c0_16 = arith.constant 0 : index
    %20 = vector.load %arg7[%c0_15, %c0_16] : memref<1x128xf32, #tpu.memory_space<vmem>>, vector<1x128xf32>
    %21 = vector.broadcast %20 : vector<1x128xf32> to vector<16x128xf32>
    %22 = arith.addf %19, %21 : vector<16x128xf32>
    %c0_17 = arith.constant 0 : index
    %c0_18 = arith.constant 0 : index
    %23 = vector.load %arg1[%c0_17, %c0_18] : memref<16x128xf32, #tpu.memory_space<vmem>>, vector<16x128xf32>
    %24 = arith.addf %22, %23 : vector<16x128xf32>
    %c0_19 = arith.constant 0 : index
    %c0_20 = arith.constant 0 : index
    %25 = vector.load %arg8[%c0_19, %c0_20] : memref<16x128xf32, #tpu.memory_space<vmem>>, vector<16x128xf32>
    tpu.vector_store %arg8[%c0_19, %c0_20], %24 {strides = array<i32>} : memref<16x128xf32, #tpu.memory_space<vmem>>, vector<16x128xf32>,
    return
  }
  func.func @transform_0(%arg0: i32) -> (i32, i32) {
    %c0_i32 = arith.constant 0 : i32
    %c0_i32_0 = arith.constant 0 : i32
    return %arg0, %c0_i32 : i32, i32
  }
  func.func @transform_1(%arg0: i32) -> (i32, i32) {
    %c0_i32 = arith.constant 0 : i32
    %c0_i32_0 = arith.constant 0 : i32
    %c0_i32_1 = arith.constant 0 : i32
    return %c0_i32, %c0_i32_0 : i32, i32
  }
  func.func @transform_2(%arg0: i32) -> (i32, i32) {
    %c0_i32 = arith.constant 0 : i32
    %c0_i32_0 = arith.constant 0 : i32
    %c0_i32_1 = arith.constant 0 : i32
    return %c0_i32, %c0_i32_0 : i32, i32
  }
  func.func @transform_3(%arg0: i32) -> (i32, i32) {
    %c0_i32 = arith.constant 0 : i32
    %c0_i32_0 = arith.constant 0 : i32
    %c0_i32_1 = arith.constant 0 : i32
    return %c0_i32, %c0_i32_0 : i32, i32
  }
  func.func @transform_4(%arg0: i32) -> (i32, i32) {
    %c0_i32 = arith.constant 0 : i32
    %c0_i32_0 = arith.constant 0 : i32
    %c0_i32_1 = arith.constant 0 : i32
    return %c0_i32, %c0_i32_0 : i32, i32
  }
  func.func @transform_5(%arg0: i32) -> (i32, i32) {
    %c0_i32 = arith.constant 0 : i32
    %c0_i32_0 = arith.constant 0 : i32
    %c0_i32_1 = arith.constant 0 : i32
    return %c0_i32, %c0_i32_0 : i32, i32
  }
  func.func @transform_6(%arg0: i32) -> (i32, i32) {
    %c0_i32 = arith.constant 0 : i32
    %c0_i32_0 = arith.constant 0 : i32
    %c0_i32_1 = arith.constant 0 : i32
    return %c0_i32, %c0_i32_0 : i32, i32
  }
  func.func @transform_7(%arg0: i32) -> (i32, i32) {
    %c0_i32 = arith.constant 0 : i32
    %c0_i32_0 = arith.constant 0 : i32
    return %arg0, %c0_i32 : i32, i32
  }
}

module attributes {stable_mosaic.version = 11 : i64} {
  func.func @_transition_kernel(%arg0: i32, %arg1: memref<16x128xf32, #tpu.memory_space<vmem>>, %arg2: memref<128x128xbf16, #tpu.memory_space<vmem>>, %arg3: memref<1x128xf32, #tpu.memory_space<vmem>>, %arg4: memref<128x128xbf16, #tpu.memory_space<vmem>>, %arg5: memref<1x128xf32, #tpu.memory_space<vmem>>, %arg6: memref<128x128xbf16, #tpu.memory_space<vmem>>, %arg7: memref<1x128xf32, #tpu.memory_space<vmem>>, %arg8: memref<16x128xf32, #tpu.memory_space<vmem>>) attributes {dimension_semantics = [#tpu.dimension_semantics<parallel>], iteration_bounds = array<i64: 3>, scalar_prefetch = 0 : i64, scratch_operands = 0 : i64, tpu.core_type = #tpu.core_type<tc>, window_params = [{transform_indices = @transform_0, window_bounds = array<i64: 16, 128>}, {pipeline_mode = #tpu.pipeline_mode<synchronous>, transform_indices = @transform_1, window_bounds = array<i64: 128, 128>}, {pipeline_mode = #tpu.pipeline_mode<synchronous>, transform_indices = @transform_2, window_bounds = array<i64: 1, 128>}, {pipeline_mode = #tpu.pipeline_mode<synchronous>, transform_indices = @transform_3, window_bounds = array<i64: 128, 128>}, {pipeline_mode = #tpu.pipeline_mode<synchronous>, transform_indices = @transform_4, window_bounds = array<i64: 1, 128>}, {pipeline_mode = #tpu.pipeline_mode<synchronous>, transform_indices = @transform_5, window_bounds = array<i64: 128, 128>}, {pipeline_mode = #tpu.pipeline_mode<synchronous>, transform_indices = @transform_6, window_bounds = array<i64: 1, 128>}, {transform_indices = @transform_7, window_bounds = array<i64: 16, 128>}]} {
    %c0 = arith.constant 0 : index
    %c0_0 = arith.constant 0 : index
    %0 = vector.load %arg1[%c0, %c0_0] : memref<16x128xf32, #tpu.memory_space<vmem>>, vector<16x128xf32>
    %1 = arith.truncf %0 : vector<16x128xf32> to vector<16x128xbf16>
    %c0_1 = arith.constant 0 : index
    %c0_2 = arith.constant 0 : index
    %2 = vector.load %arg2[%c0_1, %c0_2] : memref<128x128xbf16, #tpu.memory_space<vmem>>, vector<128x128xbf16>
    %cst = arith.constant dense<0.000000e+00> : vector<16x128xf32>
    %3 = tpu.matmul %1, %2, %cst {dimension_numbers = #tpu.dot_dimension_numbers<[1], [0], [0], [1], [0, 0, 1, 1], [], []>} : vector<16x128xbf16>, vector<128x128xbf16>, vector<16x128xf32> -> vector<16x128xf32>
    %c0_3 = arith.constant 0 : index
    %c0_4 = arith.constant 0 : index
    %4 = vector.load %arg3[%c0_3, %c0_4] : memref<1x128xf32, #tpu.memory_space<vmem>>, vector<1x128xf32>
    %5 = vector.broadcast %4 : vector<1x128xf32> to vector<16x128xf32>
    %6 = arith.addf %3, %5 : vector<16x128xf32>
    %cst_5 = arith.constant 0.000000e+00 : f32
    %7 = vector.broadcast %cst_5 : f32 to vector<16x128xf32>
    %8 = arith.maximumf %6, %7 : vector<16x128xf32>
    %9 = arith.truncf %8 : vector<16x128xf32> to vector<16x128xbf16>
    %c0_6 = arith.constant 0 : index
    %c0_7 = arith.constant 0 : index
    %10 = vector.load %arg4[%c0_6, %c0_7] : memref<128x128xbf16, #tpu.memory_space<vmem>>, vector<128x128xbf16>
    %cst_8 = arith.constant dense<0.000000e+00> : vector<16x128xf32>
    %11 = tpu.matmul %9, %10, %cst_8 {dimension_numbers = #tpu.dot_dimension_numbers<[1], [0], [0], [1], [0, 0, 1, 1], [], []>} : vector<16x128xbf16>, vector<128x128xbf16>, vector<16x128xf32> -> vector<16x128xf32>
    %c0_9 = arith.constant 0 : index
    %c0_10 = arith.constant 0 : index
    %12 = vector.load %arg5[%c0_9, %c0_10] : memref<1x128xf32, #tpu.memory_space<vmem>>, vector<1x128xf32>
    %13 = vector.broadcast %12 : vector<1x128xf32> to vector<16x128xf32>
    %14 = arith.addf %11, %13 : vector<16x128xf32>
    %cst_11 = arith.constant 0.000000e+00 : f32
    %15 = vector.broadcast %cst_11 : f32 to vector<16x128xf32>
    %16 = arith.maximumf %14, %15 : vector<16x128xf32>
    %17 = arith.truncf %16 : vector<16x128xf32> to vector<16x128xbf16>
    %c0_12 = arith.constant 0 : index
    %c0_13 = arith.constant 0 : index
    %18 = vector.load %arg6[%c0_12, %c0_13] : memref<128x128xbf16, #tpu.memory_space<vmem>>, vector<128x128xbf16>
    %cst_14 = arith.constant dense<0.000000e+00> : vector<16x128xf32>
    %19 = tpu.matmul %17, %18, %cst_14 {dimension_numbers = #tpu.dot_dimension_numbers<[1], [0], [0], [1], [0, 0, 1, 1], [], []>} : vector<16x128xbf16>, vector<128x128xbf16>, vector<16x128xf32> -> vector<16x128xf32>
    %c0_15 = arith.constant 0 : index
    %c0_16 = arith.constant 0 : index
    %20 = vector.load %arg7[%c0_15, %c0_16] : memref<1x128xf32, #tpu.memory_space<vmem>>, vector<1x128xf32>
    %21 = vector.broadcast %20 : vector<1x128xf32> to vector<16x128xf32>
    %22 = arith.addf %19, %21 : vector<16x128xf32>
    %c0_17 = arith.constant 0 : index
    %c0_18 = arith.constant 0 : index
    %23 = vector.load %arg1[%c0_17, %c0_18] : memref<16x128xf32, #tpu.memory_space<vmem>>, vector<16x128xf32>
    %24 = arith.addf %22, %23 : vector<16x128xf32>
    %c0_19 = arith.constant 0 : index
    %c0_20 = arith.constant 0 : index
    %25 = vector.load %arg8[%c0_19, %c0_20] : memref<16x128xf32, #tpu.memory_space<vmem>>, vector<16x128xf32>
    tpu.vector_store %arg8[%c0_19, %c0_20], %24 {strides = array<i32>} : memref<16x128xf32, #tpu.memory_space<vmem>>, vector<16x128xf32>,
    return
  }
  func.func @transform_0(%arg0: i32) -> (i32, i32) {
    %c0_i32 = arith.constant 0 : i32
    %c0_i32_0 = arith.constant 0 : i32
    return %arg0, %c0_i32 : i32, i32
  }
  func.func @transform_1(%arg0: i32) -> (i32, i32) {
    %c0_i32 = arith.constant 0 : i32
    %c0_i32_0 = arith.constant 0 : i32
    %c0_i32_1 = arith.constant 0 : i32
    return %c0_i32, %c0_i32_0 : i32, i32
  }
  func.func @transform_2(%arg0: i32) -> (i32, i32) {
    %c0_i32 = arith.constant 0 : i32
    %c0_i32_0 = arith.constant 0 : i32
    %c0_i32_1 = arith.constant 0 : i32
    return %c0_i32, %c0_i32_0 : i32, i32
  }
  func.func @transform_3(%arg0: i32) -> (i32, i32) {
    %c0_i32 = arith.constant 0 : i32
    %c0_i32_0 = arith.constant 0 : i32
    %c0_i32_1 = arith.constant 0 : i32
    return %c0_i32, %c0_i32_0 : i32, i32
  }
  func.func @transform_4(%arg0: i32) -> (i32, i32) {
    %c0_i32 = arith.constant 0 : i32
    %c0_i32_0 = arith.constant 0 : i32
    %c0_i32_1 = arith.constant 0 : i32
    return %c0_i32, %c0_i32_0 : i32, i32
  }
  func.func @transform_5(%arg0: i32) -> (i32, i32) {
    %c0_i32 = arith.constant 0 : i32
    %c0_i32_0 = arith.constant 0 : i32
    %c0_i32_1 = arith.constant 0 : i32
    return %c0_i32, %c0_i32_0 : i32, i32
  }
  func.func @transform_6(%arg0: i32) -> (i32, i32) {
    %c0_i32 = arith.constant 0 : i32
    %c0_i32_0 = arith.constant 0 : i32
    %c0_i32_1 = arith.constant 0 : i32
    return %c0_i32, %c0_i32_0 : i32, i32
  }
  func.func @transform_7(%arg0: i32) -> (i32, i32) {
    %c0_i32 = arith.constant 0 : i32
    %c0_i32_0 = arith.constant 0 : i32
    return %arg0, %c0_i32 : i32, i32
  }
}

</mosaic_0001>

<bundles_post_ra>
// kernel: tpu_custom_call.1
= control target key start
LH: loop header
LB: loop body
LE: loop exit
PB: predicated region body
PF: predicated region fallthrough
CT: control target
= control target key end

     0   :  { %s1582_s0 = inlined_call_operand.hbm [shape: f32[36,128], index: 0, kind: input, shape index: {}]   ;;  %s1583_s1 = inlined_call_operand.hbm [shape: bf16[128,128], index: 1, kind: input, shape index: {}]   ;;  %s1584_s2 = inlined_call_operand.vmem [shape: f32[1,128], index: 2, kind: input, shape index: {}]   ;;  %s1585_s3 = inlined_call_operand.hbm [shape: bf16[128,128], index: 3, kind: input, shape index: {}]   ;;  %s1586_s4 = inlined_call_operand.vmem [shape: f32[1,128], index: 4, kind: input, shape index: {}]   ;;  %s1587_s5 = inlined_call_operand.hbm [shape: bf16[128,128], index: 5, kind: input, shape index: {}]   ;;  %s1588_s6 = inlined_call_operand.vmem [shape: f32[1,128], index: 6, kind: input, shape index: {}]   ;;  %s1589_s7 = inlined_call_operand.hbm [shape: f32[36,128], index: 7, kind: output, shape index: {}]  }
   0x1   :  { %1592 = sst [smem:[#allocation15_spill]] %s1583_s1 }
   0x2   :  { %1593 = sst [smem:[#allocation16_spill]] %s1585_s3 }
   0x3   :  { %12 = vsyncpa [#allocation3], 0 }
   0x4   :  { %14 = vsyncpa [#allocation3 + $0x1], 0 }
   0x5   :  { %15 = vsyncpa [#allocation6], 0 }
   0x6   :  { %16 = vsyncpa [#allocation9], 0 }
   0x7   :  { %17 = vsyncpa [#allocation4], 0 }
   0x8   :  { %19 = vsyncpa [#allocation4 + $0x1], 0  ;;  %s1306_s24 = smov 0   ;;  %s1308_s25 = smov 0  }
   0x9   :  { %s1310_s26 = smov 0   ;;  %s1312_s27 = smov 0  }
   0xa LB: > { %s1327_s28 = sadd.s32 4294967295, %s1251_s27   ;;  %s829_s29 = sadd.s32 4294967294, %s1251_s27   ;;  %s1251_s27 = sphi %s1312_s27, %s1612_s27   ;;  %s1247_s26 = sphi %s1310_s26, %s1611_s26   ;;  %s1243_s25 = sphi %s1308_s25, %s1610_s25   ;;  %s1239_s24 = sphi %s1306_s24, %s1609_s24  }
   0xb   : > { %s1331_s30 = sadd.s32 1, %s1251_s27   ;;  %s32_s8 = sadd.s32 1, %s1247_s26 }
   0xc   : > { %s29_s9 = ssub.s32 %s1251_s27, %s1331_s30  ;;  %p39_p0 = scmp.ne.s32.totalorder %s1247_s26, %s1243_s25 }
   0xd   : > { %p30_p1 = scmp.eq.s32.totalorder %s29_s9, 0  ;;  %p40_p2 = scmp.eq.s32.totalorder %s1251_s27, 0 }
   0xe   : > { %p45_p3 = scmp.ne.s32.totalorder %s1243_s25, %s1239_s24  ;;  %p1590_p4 = scmp.eq.s32.totalorder %s1327_s28, 0 }
   0xf   : > { %s1343_s10 = scalar_select %p30_p1, %s1247_s26, %s32_s8  }
  0x10   : > { %p1345_p5 = por %p40_p2, %p39_p0  ;;  %p1351_p6 = por %p1590_p4, %p45_p3 }
  0x11   : > { %p195_p7 = scmp.eq.s32.totalorder %s1327_s28, 2  ;;  %p201_p8 = scmp.eq.s32.totalorder %s829_s29, 2 }
  0x12   : > { %s1595_s12 = scalar_select %p1351_p6, 1, 0 }
  0x13   : > { %p830_p9 = scmp.ge.s32.totalorder %s1251_s27, 1  ;;  %p208_p10 = scmp.lt.s32.totalorder %s1251_s27, 4 }
  0x14   : > { %p1358_p11 = por %p195_p7, %p39_p0  ;;  %p1362_p12 = por %p201_p8, %p45_p3 }
  0x15   : > { %p1366_p13 = pnand %p830_p9, %p208_p10  ;;  %s1253_s16 = smov [#allocation5]  }
  0x16   : > { %s1596_s13 = scalar_select %p1358_p11, 1, 0 }
  0x17   : > { %s1597_s14 = scalar_select %p1362_p12, 1, 0 }
  0x18   : > { %p987_p1 = pneg %p1366_p13  ;;  %s220_s17 = sshll.u32 %s1253_s16, 4  ;;  %s221_s17 = int_to_ptr.vmem [resolvable:$true] %s220_s17 }
  0x19   : > { %s1254_s19 = smov [#allocation7]   ;;  %s1086_s21 = scalar_lea.vmem %s221_s17, 1024 }
  0x1a   : > { %p1374_p2 = pnand %p987_p1, %p1590_p4  ;;  %s236_s20 = sshll.u32 %s1254_s19, 4  ;;  %s237_s20 = int_to_ptr.vmem [resolvable:$true] %s236_s20 }
  0x1b   : > { %p1087_p3 = scmp.ne.s32.totalorder %s221_s17, %s1086_s21  ;;  %p1094_p9 = scmp.lt.s32.totalorder %s221_s17, %s221_s17 }
  0x1c   : > { %p1077_p0 = pneg %p1374_p2  ;;  %p1095_p10 = scmp.lt.s32.totalorder %s1086_s21, %s1086_s21 }
  0x1e   : > { %p1089_p7 = pnand %p1087_p3, %p1077_p0  ;;  %p1096_p12 = por %p1095_p10, %p1094_p9 }
  0x20   : > { %p1090_p8 = pneg %p1089_p7 }
  0x22   : > { %p1097_p1 = pnand %p1096_p12, %p1090_p8 }
  0x24   : > { %1100 = shalt.err (!%p1097_p1)
}
  0x25   : > { %s1255_s22 = smov 64   ;;  %s1256_s23 = smov 4  }
  0x26   : > { %s1600_s1 = sld [smem:[#allocation15_spill]]  ;;  %s1112_s9 = scalar_lea.vmem %s237_s20, 1024 }
  0x27   : > { %p1113_p4 = scmp.ne.s32.totalorder %s237_s20, %s1112_s9  ;;  %p1120_p11 = scmp.lt.s32.totalorder %s237_s20, %s237_s20 }
  0x28   : > { %p1121_p6 = scmp.lt.s32.totalorder %s1112_s9, %s1112_s9 }
  0x29   : > { %p1115_p3 = pnand %p1113_p4, %p1077_p0 }
  0x2a   : > { %p1122_p9 = por %p1121_p6, %p1120_p11 }
  0x2b   : > { %p1116_p7 = pneg %p1115_p3 }
  0x2c   : > { %990 = dma.hbm_to_vmem [thread:$0]  (!%p1374_p2), %s1600_s1, 1024, %s221_s17, [#allocation6], %s1255_s22, %s1255_s22, %s1256_s23  }
  0x2d   : > { %p1123_p12 = pnand %p1122_p9, %p1116_p7 }
  0x2f   : > { %1126 = shalt.err (!%p1123_p12)
}
  0x30   : > { %s1601_s3 = sld [smem:[#allocation16_spill]]  ;;  %s1257_s21 = smov [#allocation8]  }
  0x31   : > { %s252_s17 = sshll.u32 %s1257_s21, 4  ;;  %s253_s17 = int_to_ptr.vmem [resolvable:$true] %s252_s17 }
  0x32   : > { %s1138_s29 = scalar_lea.vmem %s253_s17, 1024  ;;  %p1146_p1 = scmp.lt.s32.totalorder %s253_s17, %s253_s17 }
  0x33   : > { %p1139_p8 = scmp.ne.s32.totalorder %s253_s17, %s1138_s29  ;;  %p1147_p6 = scmp.lt.s32.totalorder %s1138_s29, %s1138_s29 }
  0x35   : > { %p1141_p4 = pnand %p1139_p8, %p1077_p0  ;;  %p1148_p11 = por %p1147_p6, %p1146_p1 }
  0x36   : > { %993 = dma.hbm_to_vmem [thread:$0]  (!%p1374_p2), %s1601_s3, 1024, %s237_s20, [#allocation6], %s1255_s22, %s1255_s22, %s1256_s23  }
  0x37   : > { %p1142_p10 = pneg %p1141_p4 }
  0x39   : > { %p1149_p3 = pnand %p1148_p11, %p1142_p10 }
  0x3b   : > { %1152 = shalt.err (!%p1149_p3)
}
  0x3c   : > { %996 = dma.hbm_to_vmem [thread:$0]  (!%p1374_p2), %s1587_s5, 1024, %s253_s17, [#allocation9], %s1255_s22, %s1255_s22, %s1256_s23  }
  0x3d   : > { %p834_p7 = scmp.ge.s32.totalorder %s1251_s27, 3 }
  0x3f   : > { %265 = sbr.rel (%p834_p7) target bundleno = 100 (0x64), region = 40 }
  0x44   : > { %268 = sbr.rel (!%p1345_p5) target bundleno = 100 (0x64), region = 44  ;;  %s269_s20 = sand.u32 (%p1345_p5), 1, %s1247_s26  }
  0x45   : > { %s836_s16 = sshll.u32 (%p1345_p5), %s1251_s27, 1  ;;  %s835_s19 = sshll.u32 (%p1345_p5), %s269_s20, 4 }
  0x46   : > { %s275_s21 = ssub.s32 (%p1345_p5), 5, %s836_s16  ;;  %s1412_s8 = scalar_lea.sflag (%p1345_p5), [#allocation3], %s269_s20 }
  0x47   : > { %p276_p0 = scmp.lt.s32.totalorder (%p1345_p5), %s275_s21, 2  ;;  %s273_s22 = scalar_lea.vmem (%p1345_p5), [#allocation2], %s835_s19 }
  0x49   : > { %s1614_s21 = smov (!%p276_p0, %s275_s21), 2 }
  0x4a   : > { %s1409_s29 = sshll.u32 %s1614_s21, 7 }
  0x4b   : > { %s280_s18 = ssub.s32 256, %s1409_s29 }
  0x4c   : > { %281 = vsyncadd %s1412_s8, %s280_s18  ;;  %p838_p5 = scmp.ne.s32.totalorder %s1409_s29, 0  ;;  %s884_s11 = sshll.u32 %s1251_s27, 8 }
  0x4d   : > { %s1420_s9 = scalar_lea.hbm %s1582_s0, %s884_s11  ;;  %s286_s16 = sshll.u32 %s273_s22, 4  ;;  %s1422_s16 = int_to_ptr.vmem [resolvable:$true] %s286_s16 }
  0x4e   : > { %s1153_s20 = scalar_lea.hbm %s1420_s9, %s1409_s29  ;;  %s1157_s18 = scalar_lea.hbm %s1582_s0, 640 }
  0x4f   : > { %p1154_p2 = scmp.ne.s32.totalorder %s1420_s9, %s1153_s20  ;;  %p1158_p8 = scmp.lt.s32.totalorder %s1420_s9, %s1582_s0 }
  0x50   : > { %p1159_p4 = scmp.lt.s32.totalorder %s1157_s18, %s1153_s20 }
  0x51   : > { %p1155_p9 = pnand %p1154_p2, %p838_p5 }
  0x52   : > { %p1160_p10 = por %p1159_p4, %p1158_p8 }
  0x53   : > { %p1156_p12 = pneg %p1155_p9 }
  0x55   : > { %p1161_p1 = pnand %p1160_p10, %p1156_p12 }
  0x57   : > { %1164 = shalt.err (!%p1161_p1)
}
  0x58   : > { %s1165_s22 = scalar_lea.vmem %s1422_s16, %s1409_s29  ;;  %s1258_s11 = smov [#allocation2]  }
  0x59   : > { %p1166_p6 = scmp.ne.s32.totalorder %s1422_s16, %s1165_s22  ;;  %s1169_s23 = sshll.u32 %s1258_s11, 4  ;;  %s1170_s23 = int_to_ptr.vmem [resolvable:$false] %s1169_s23 }
  0x5a   : > { %s1171_s17 = scalar_lea.vmem %s1170_s23, 512  ;;  %p1172_p7 = scmp.lt.s32.totalorder %s1422_s16, %s1170_s23 }
  0x5b   : > { %p1167_p11 = pnand %p1166_p6, %p838_p5  ;;  %p1173_p0 = scmp.lt.s32.totalorder %s1171_s17, %s1165_s22 }
  0x5d   : > { %p1168_p3 = pneg %p1167_p11  ;;  %p1174_p2 = por %p1173_p0, %p1172_p7 }
  0x5f   : > { %p1175_p9 = pnand %p1174_p2, %p1168_p3 }
  0x61   : > { %1178 = shalt.err (!%p1175_p9)
}
  0x62   : > { %s1259_s1 = smov 128   ;;  %s1260_s3 = smov 8  }
  0x63   : > { %292 = dma.hbm_to_vmem [thread:$0]  (%p838_p5), %s1420_s9, %s1409_s29, %s1422_s16, %s1412_s8, %s1259_s1, %s1259_s1, %s1260_s3  }
  0x64 PF: > { %298 = sbr.rel (%p1366_p13) target bundleno = 781 (0x30d), region = 48  ;;  %s1451_s20 = sand.u32 (!%p1366_p13), 1, %s1243_s25  }
  0x65   : > { %s843_s19 = sshll.u32 (!%p1366_p13), %s1451_s20, 4  ;;  %s301_s21 = scalar_lea.sflag (!%p1366_p13), [#allocation3], %s1451_s20 }
  0x66   : > { %s1457_s18 = scalar_lea.vmem (!%p1366_p13), [#allocation2], %s843_s19  ;;  %p1602_p12 = scmp.ne.s32.totalorder (!%p1366_p13), %s1595_s12, 0 }
  0x69   : > { %1222 = dma.done.wait (%p1602_p12), %s301_s21, 256  }
  0x6a   : > { %1224 = vsyncadd (%p1602_p12), %s301_s21, 4294967040  ;;  %p1603_p5 = scmp.eq.s32.totalorder %s1327_s28, 0 }
  0x6c   : > { %1226 = dma.done.wait (%p1603_p5), [#allocation6], 2048   ;;  %p1604_p13 = pmov %p1603_p5 }
  0x6d   : > { %p1605_p8 = pmov %p1603_p5 }
  0x6e   : > { %1228 = vsyncadd (%p1604_p13), [#allocation6], 4294965248 }
  0x6f   : > { %1230 = dma.done.wait (%p1605_p8), [#allocation9], 1024   ;;  %p1606_p4 = pmov %p1603_p5 }
  0x70   : > { %v1261_v0 = vmov 0.0   ;;  %vm1262_vm0 = vmmov 0   ;;  %v1051_v1 = vld [vmem:[#allocation5 + $0x38] sm:$0xff]   ;;  %v1052_v2 = vld [vmem:[#allocation5 + $0x30] sm:$0xff]   ;;  %v1053_v3 = vld [vmem:[#allocation5 + $0x28] sm:$0xff]   ;;  %s346_s22 = scalar_lea.vmem [#allocation10], %s843_s19 }
  0x71   : > { %1232 = vsyncadd (%p1606_p4), [#allocation9], 4294966272  ;;  %913 = vmatprep.subr.bf16.mxu0 %v1261_v0  ;;  %929 = vmatprep.mubr.msk.bf16.mxu0 %vm1262_vm0, %v1261_v0  ;;  %v1059_v4 = vld [vmem:[#allocation7 + $0x38] sm:$0xff]   ;;  %v1054_v5 = vld [vmem:[#allocation5 + $0x20] sm:$0xff]   ;;  %s708_s11 = scalar_lea.sflag [#allocation4], %s1451_s20  ;;  %p1607_p10 = scmp.ne.s32.totalorder %s1596_s13, 0 }
  0x72   : > { %933 = vmatprep.subr.bf16.mxu1 %v1261_v0  ;;  %949 = vmatprep.mubr.msk.bf16.mxu1 %vm1262_vm0, %v1261_v0  ;;  %v1060_v6 = vld [vmem:[#allocation7 + $0x30] sm:$0xff]   ;;  %v1055_v7 = vld [vmem:[#allocation5 + $0x18] sm:$0xff]   ;;  %v1061_v8 = vld [vmem:[#allocation7 + $0x28] sm:$0xff]   ;;  %s876_s23 = sshll.u32 (%p1607_p10), %s1327_s28, 1 }
  0x73   : > { %914 = vmatpush3.bf16.msra.mxu0 %v1051_v1  ;;  %934 = vmatpush3.bf16.msra.mxu1 %v1059_v4  ;;  %v1056_v9 = vld [vmem:[#allocation5 + $0x10] sm:$0xff]   ;;  %v1062_v10 = vld [vmem:[#allocation7 + $0x20] sm:$0xff]   ;;  %v1057_v11 = vld [vmem:[#allocation5 + $0x8] sm:$0xff]   ;;  %s716_s17 = ssub.s32 (%p1607_p10), 5, %s876_s23 }
  0x74   : > { %915 = vmatprep.subr.bf16.mxu0 %v1261_v0  ;;  %935 = vmatprep.subr.bf16.mxu1 %v1261_v0  ;;  %v1063_v12 = vld [vmem:[#allocation7 + $0x18] sm:$0xff]   ;;  %v1058_v13 = vld [vmem:[#allocation5] sm:$0xff]   ;;  %v1064_v17 = vld [vmem:[#allocation7 + $0x10] sm:$0xff]   ;;  %p717_p1 = scmp.lt.s32.totalorder (%p1607_p10), %s716_s17, 2 }
  0x75   : > { %v1488_v14 = vld [vmem:[%s1457_s18] sm:$0xff]  ;;  %v1491_v15 = vld [vmem:[%s1457_s18 + $0x8] sm:$0xff] }
  0x76   : > { %v360_v16 = vpack.c.bf16 %v1491_v15, %v1488_v14  ;;  %v1065_v18 = vld [vmem:[#allocation7 + $0x8] sm:$0xff]   ;;  %v1066_v19 = vld [vmem:[#allocation7] sm:$0xff]   ;;  %v1067_v20 = vld [vmem:[#allocation8 + $0x38] sm:$0xff]  }
  0x77   : > { %916 = vmatpush3.bf16.msra.mxu0 %v1052_v2  ;;  %936 = vmatpush3.bf16.msra.mxu1 %v1060_v6  ;;  %v1068_v21 = vld [vmem:[#allocation8 + $0x30] sm:$0xff]   ;;  %v1069_v22 = vld [vmem:[#allocation8 + $0x28] sm:$0xff]   ;;  %v1070_v23 = vld [vmem:[#allocation8 + $0x20] sm:$0xff]  }
  0x78   : > { %917 = vmatprep.subr.bf16.mxu0 %v1261_v0  ;;  %937 = vmatprep.subr.bf16.mxu1 %v1261_v0  ;;  %v1071_v24 = vld [vmem:[#allocation8 + $0x18] sm:$0xff]   ;;  %v848_v25 = vld [vmem:[%s1584_s2] ss:$0 sm:$0xff]  ;;  %v1072_v35 = vld [vmem:[#allocation8 + $0x10] sm:$0xff]  }
  0x79   : > { %v1073_v36 = vld [vmem:[#allocation8 + $0x8] sm:$0xff]   ;;  %v1074_v37 = vld [vmem:[#allocation8] sm:$0xff]  }
  0x7a   : > { %v857_v38 = vld [vmem:[%s1586_s4] ss:$0 sm:$0xff] }
  0x7b   : > { %918 = vmatpush3.bf16.msra.mxu0 %v1053_v3  ;;  %938 = vmatpush3.bf16.msra.mxu1 %v1061_v8  ;;  %v866_v48 = vld [vmem:[%s1588_s6] ss:$0 sm:$0xff] }
  0x7c   : > { %919 = vmatprep.subr.bf16.mxu0 %v1261_v0  ;;  %939 = vmatprep.subr.bf16.mxu1 %v1261_v0 }
  0x7f   : > { %920 = vmatpush3.bf16.msra.mxu0 %v1054_v5  ;;  %940 = vmatpush3.bf16.msra.mxu1 %v1062_v10 }
  0x80   : > { %921 = vmatprep.subr.bf16.mxu0 %v1261_v0  ;;  %941 = vmatprep.subr.bf16.mxu1 %v1261_v0 }
  0x83   : > { %922 = vmatpush3.bf16.msra.mxu0 %v1055_v7  ;;  %942 = vmatpush3.bf16.msra.mxu1 %v1063_v12 }
  0x84   : > { %923 = vmatprep.subr.bf16.mxu0 %v1261_v0  ;;  %943 = vmatprep.subr.bf16.mxu1 %v1261_v0 }
  0x87   : > { %924 = vmatpush3.bf16.msra.mxu0 %v1056_v9  ;;  %944 = vmatpush3.bf16.msra.mxu1 %v1064_v17 }
  0x88   : > { %925 = vmatprep.subr.bf16.mxu0 %v1261_v0  ;;  %945 = vmatprep.subr.bf16.mxu1 %v1261_v0 }
  0x8b   : > { %926 = vmatpush3.bf16.msra.mxu0 %v1057_v11  ;;  %946 = vmatpush3.bf16.msra.mxu1 %v1065_v18 }
  0x8c   : > { %927 = vmatprep.subr.bf16.mxu0 %v1261_v0  ;;  %947 = vmatprep.subr.bf16.mxu1 %v1261_v0 }
  0x8f   : > { %928 = vmatpush3.bf16.msra.mxu0 %v1058_v13  ;;  %948 = vmatpush3.bf16.msra.mxu1 %v1066_v19 }
  0x90   : > { %953 = vmatprep.subr.bf16.mxu0 %v1261_v0 }
  0x92   : > { %930 = vmatmul.mubr.bf16.vlgmr.msra.gmra.mxu0 %v360_v16 }
  0x93   : > { %969 = vmatprep.mubr.msk.bf16.mxu0 %vm1262_vm0, %v1261_v0  ;;  %954 = vmatpush3.bf16.msra.mxu0 %v1067_v20 }
  0x94   : > { %955 = vmatprep.subr.bf16.mxu0 %v1261_v0 }
  0x97   : > { %956 = vmatpush3.bf16.msra.mxu0 %v1068_v21 }
  0x98   : > { %957 = vmatprep.subr.bf16.mxu0 %v1261_v0 }
  0x9b   : > { %958 = vmatpush3.bf16.msra.mxu0 %v1069_v22 }
  0x9c   : > { %959 = vmatprep.subr.bf16.mxu0 %v1261_v0 }
  0x9f   : > { %960 = vmatpush3.bf16.msra.mxu0 %v1070_v23 }
  0xa0   : > { %961 = vmatprep.subr.bf16.mxu0 %v1261_v0 }
  0xa3   : > { %962 = vmatpush3.bf16.msra.mxu0 %v1071_v24 }
  0xa4   : > { %963 = vmatprep.subr.bf16.mxu0 %v1261_v0 }
  0xa7   : > { %964 = vmatpush3.bf16.msra.mxu0 %v1072_v35 }
  0xa8   : > { %965 = vmatprep.subr.bf16.mxu0 %v1261_v0 }
  0xab   : > { %966 = vmatpush3.bf16.msra.mxu0 %v1073_v36 }
  0xac   : > { %967 = vmatprep.subr.bf16.mxu0 %v1261_v0 }
  0xaf   : > { %968 = vmatpush3.bf16.msra.mxu0 %v1074_v37 }
 0x152   : > { %v466_v26 = vpop.f32.mrf.mxu0 }
 0x153   : > { %v467_v28 = vadd.f32 %v848_v25, %v466_v26 }
 0x154   : > { %v931_v27 = vpop.f32.mrf.mxu0 }
 0x155   : > { %v473_v32 = vmax.f32 %v467_v28, 0.0 }
 0x156   : > { %v469_v29 = vpop.f32.mrf.mxu0 }
 0x157   : > { %v470_v30 = vadd.f32 %v848_v25, %v469_v29 }
 0x158   : > { %v932_v31 = vpop.f32.mrf.mxu0 }
 0x159   : > { %v474_v33 = vmax.f32 %v470_v30, 0.0 }
 0x15b   : > { %v475_v34 = vpack.c.bf16 %v474_v33, %v473_v32 }
 0x15d   : > { %950 = vmatmul.mubr.bf16.vlgmr.msra.gmra.mxu1 %v475_v34 }
 0x21d   : > { %v581_v39 = vpop.f32.mrf.mxu1 }
 0x21e   : > { %v582_v41 = vadd.f32 %v857_v38, %v581_v39 }
 0x21f   : > { %v951_v40 = vpop.f32.mrf.mxu1 }
 0x220   : > { %v588_v45 = vmax.f32 %v582_v41, 0.0 }
 0x221   : > { %v584_v42 = vpop.f32.mrf.mxu1 }
 0x222   : > { %v585_v43 = vadd.f32 %v857_v38, %v584_v42 }
 0x223   : > { %v952_v44 = vpop.f32.mrf.mxu1 }
 0x224   : > { %v589_v46 = vmax.f32 %v585_v43, 0.0 }
 0x226   : > { %v590_v47 = vpack.c.bf16 %v589_v46, %v588_v45 }
 0x228   : > { %970 = vmatmul.mubr.bf16.vlgmr.msra.gmra.mxu0 %v590_v47 }
 0x2e8   : > { %v696_v49 = vpop.f32.mrf.mxu0 }
 0x2e9   : > { %v697_v50 = vadd.f32 %v866_v48, %v696_v49 }
 0x2ea   : > { %v971_v51 = vpop.f32.mrf.mxu0 }
 0x2eb   : > { %v703_v52 = vadd.f32 %v697_v50, %v1488_v14 }
 0x2ec   : > { %v699_v53 = vpop.f32.mrf.mxu0 }
 0x2ed   : > { %705 = vst [vmem:[%s346_s22] sm:$0xff] %v703_v52  ;;  %v700_v54 = vadd.f32 %v866_v48, %v699_v53  ;;  %714 = sbr.rel (!%p1607_p10) target bundleno = 781 (0x30d), region = 68 }
 0x2ee   : > { %v972_v55 = vpop.f32.mrf.mxu0 }
 0x2ef   : > { %v704_v56 = vadd.f32 %v700_v54, %v1491_v15 }
 0x2f1   : > { %706 = vst [vmem:[%s346_s22 + $0x8] sm:$0xff] %v704_v56 }
 0x2f2   : > { %s1616_s17 = smov (!%p717_p1, %s716_s17), 2 }
 0x2f3   : > { %s1526_s1 = sshll.u32 %s1616_s17, 7 }
 0x2f4   : > { %s721_s3 = ssub.s32 256, %s1526_s1 }
 0x2f5   : > { %722 = vsyncadd %s708_s11, %s721_s3  ;;  %p878_p6 = scmp.ne.s32.totalorder %s1526_s1, 0  ;;  %s885_s19 = sshll.u32 %s1327_s28, 8 }
 0x2f6   : > { %s1536_s18 = scalar_lea.hbm %s1589_s7, %s885_s19  ;;  %s727_s12 = sshll.u32 %s346_s22, 4  ;;  %s1538_s12 = int_to_ptr.vmem [resolvable:$true] %s727_s12 }
 0x2f7   : > { %s1179_s15 = scalar_lea.vmem %s1538_s12, %s1526_s1  ;;  %s1263_s29 = smov [#allocation10]  }
 0x2f8   : > { %p1180_p11 = scmp.ne.s32.totalorder %s1538_s12, %s1179_s15  ;;  %s1183_s8 = sshll.u32 %s1263_s29, 4  ;;  %s1184_s8 = int_to_ptr.vmem [resolvable:$false] %s1183_s8 }
 0x2f9   : > { %s1185_s28 = scalar_lea.vmem %s1184_s8, 512  ;;  %p1186_p0 = scmp.lt.s32.totalorder %s1538_s12, %s1184_s8 }
 0x2fa   : > { %p1181_p3 = pnand %p1180_p11, %p878_p6  ;;  %p1187_p2 = scmp.lt.s32.totalorder %s1185_s28, %s1179_s15 }
 0x2fc   : > { %p1182_p7 = pneg %p1181_p3  ;;  %p1188_p9 = por %p1187_p2, %p1186_p0 }
 0x2fe   : > { %p1189_p12 = pnand %p1188_p9, %p1182_p7 }
 0x300   : > { %1192 = shalt.err (!%p1189_p12)
}
 0x301   : > { %s1193_s9 = scalar_lea.hbm %s1536_s18, %s1526_s1  ;;  %s1197_s23 = scalar_lea.hbm %s1589_s7, 640 }
 0x302   : > { %p1194_p5 = scmp.ne.s32.totalorder %s1536_s18, %s1193_s9  ;;  %p1198_p4 = scmp.lt.s32.totalorder %s1536_s18, %s1589_s7 }
 0x303   : > { %p1199_p10 = scmp.lt.s32.totalorder %s1197_s23, %s1193_s9 }
 0x304   : > { %p1195_p13 = pnand %p1194_p5, %p878_p6 }
 0x305   : > { %p1200_p1 = por %p1199_p10, %p1198_p4 }
 0x306   : > { %p1196_p8 = pneg %p1195_p13 }
 0x308   : > { %p1201_p11 = pnand %p1200_p1, %p1196_p8 }
 0x30a   : > { %1204 = shalt.err (!%p1201_p11)
}
 0x30b   : > { %s1264_s19 = smov 128   ;;  %s1265_s13 = smov 8  }
 0x30c   : > { %733 = dma.vmem_to_hbm [thread:$0]  (%p878_p6), %s1538_s12, %s1526_s1, %s1536_s18, %s708_s11, %s1264_s19, %s1264_s19, %s1265_s13  }
 0x30d PF: > { %p1007_p3 = scmp.ge.s32.totalorder %s1251_s27, 2  ;;  %s742_s21 = sand.u32 1, %s1239_s24  }
 0x30e   : > { %p1608_p7 = scmp.ne.s32.totalorder %s1597_s14, 0  ;;  %s743_s15 = scalar_lea.sflag [#allocation4], %s742_s21 }
 0x310   : > { %p998_p0 = pnand %p1007_p3, %p1608_p7 }
 0x312   : > { %p999_p2 = pneg %p998_p0 }
 0x314   : > { %1234 = dma.done.wait (%p999_p2), %s743_s15, 256  }
 0x315   : > { %1236 = vsyncadd (%p999_p2), %s743_s15, 4294967040  ;;  %p22_p9 = scmp.ge.s32.totalorder %s1331_s30, 5   ;;  %s1609_s24 = smov %s1243_s25 }
 0x316   : > { %s1610_s25 = smov %s1247_s26  ;;  %s1611_s26 = smov %s1343_s10 }
 0x317   : > { %s1612_s27 = smov %s1331_s30  ;;  %24 = sbr.rel (!%p22_p9) target bundleno = 10 (0xa), region = 105 }
 0x31c   :  { %748 = vsyncpa [#allocation3], 1 }
 0x31d   :  { %750 = vsyncpa [#allocation3 + $0x1], 1 }
 0x31e   :  { %751 = vsyncpa [#allocation6], 1 }
 0x31f   :  { %752 = vsyncpa [#allocation9], 1 }
 0x320   :  { %753 = vsyncpa [#allocation4], 1 }
 0x321   :  { %755 = vsyncpa [#allocation4 + $0x1], 1 }

// kernel: tpu_custom_call.1
= control target key start
LH: loop header
LB: loop body
LE: loop exit
PB: predicated region body
PF: predicated region fallthrough
CT: control target
= control target key end

     0   :  { %s1582_s0 = inlined_call_operand.hbm [shape: f32[36,128], index: 0, kind: input, shape index: {}]   ;;  %s1583_s1 = inlined_call_operand.hbm [shape: bf16[128,128], index: 1, kind: input, shape index: {}]   ;;  %s1584_s2 = inlined_call_operand.vmem [shape: f32[1,128], index: 2, kind: input, shape index: {}]   ;;  %s1585_s3 = inlined_call_operand.hbm [shape: bf16[128,128], index: 3, kind: input, shape index: {}]   ;;  %s1586_s4 = inlined_call_operand.vmem [shape: f32[1,128], index: 4, kind: input, shape index: {}]   ;;  %s1587_s5 = inlined_call_operand.hbm [shape: bf16[128,128], index: 5, kind: input, shape index: {}]   ;;  %s1588_s6 = inlined_call_operand.vmem [shape: f32[1,128], index: 6, kind: input, shape index: {}]   ;;  %s1589_s7 = inlined_call_operand.hbm [shape: f32[36,128], index: 7, kind: output, shape index: {}]  }
   0x1   :  { %1592 = sst [smem:[#allocation15_spill]] %s1583_s1 }
   0x2   :  { %1593 = sst [smem:[#allocation16_spill]] %s1585_s3 }
   0x3   :  { %12 = vsyncpa [#allocation3], 0 }
   0x4   :  { %14 = vsyncpa [#allocation3 + $0x1], 0 }
   0x5   :  { %15 = vsyncpa [#allocation6], 0 }
   0x6   :  { %16 = vsyncpa [#allocation9], 0 }
   0x7   :  { %17 = vsyncpa [#allocation4], 0 }
   0x8   :  { %19 = vsyncpa [#allocation4 + $0x1], 0  ;;  %s1306_s24 = smov 0   ;;  %s1308_s25 = smov 0  }
   0x9   :  { %s1310_s26 = smov 0   ;;  %s1312_s27 = smov 0  }
   0xa LB: > { %s1327_s28 = sadd.s32 4294967295, %s1251_s27   ;;  %s829_s29 = sadd.s32 4294967294, %s1251_s27   ;;  %s1251_s27 = sphi %s1312_s27, %s1612_s27   ;;  %s1247_s26 = sphi %s1310_s26, %s1611_s26   ;;  %s1243_s25 = sphi %s1308_s25, %s1610_s25   ;;  %s1239_s24 = sphi %s1306_s24, %s1609_s24  }
   0xb   : > { %s1331_s30 = sadd.s32 1, %s1251_s27   ;;  %s32_s8 = sadd.s32 1, %s1247_s26 }
   0xc   : > { %s29_s9 = ssub.s32 %s1251_s27, %s1331_s30  ;;  %p39_p0 = scmp.ne.s32.totalorder %s1247_s26, %s1243_s25 }
   0xd   : > { %p30_p1 = scmp.eq.s32.totalorder %s29_s9, 0  ;;  %p40_p2 = scmp.eq.s32.totalorder %s1251_s27, 0 }
   0xe   : > { %p45_p3 = scmp.ne.s32.totalorder %s1243_s25, %s1239_s24  ;;  %p1590_p4 = scmp.eq.s32.totalorder %s1327_s28, 0 }
   0xf   : > { %s1343_s10 = scalar_select %p30_p1, %s1247_s26, %s32_s8  }
  0x10   : > { %p1345_p5 = por %p40_p2, %p39_p0  ;;  %p1351_p6 = por %p1590_p4, %p45_p3 }
  0x11   : > { %p195_p7 = scmp.eq.s32.totalorder %s1327_s28, 2  ;;  %p201_p8 = scmp.eq.s32.totalorder %s829_s29, 2 }
  0x12   : > { %s1595_s12 = scalar_select %p1351_p6, 1, 0 }
  0x13   : > { %p830_p9 = scmp.ge.s32.totalorder %s1251_s27, 1  ;;  %p208_p10 = scmp.lt.s32.totalorder %s1251_s27, 4 }
  0x14   : > { %p1358_p11 = por %p195_p7, %p39_p0  ;;  %p1362_p12 = por %p201_p8, %p45_p3 }
  0x15   : > { %p1366_p13 = pnand %p830_p9, %p208_p10  ;;  %s1253_s16 = smov [#allocation5]  }
  0x16   : > { %s1596_s13 = scalar_select %p1358_p11, 1, 0 }
  0x17   : > { %s1597_s14 = scalar_select %p1362_p12, 1, 0 }
  0x18   : > { %p987_p1 = pneg %p1366_p13  ;;  %s220_s17 = sshll.u32 %s1253_s16, 4  ;;  %s221_s17 = int_to_ptr.vmem [resolvable:$true] %s220_s17 }
  0x19   : > { %s1254_s19 = smov [#allocation7]   ;;  %s1086_s21 = scalar_lea.vmem %s221_s17, 1024 }
  0x1a   : > { %p1374_p2 = pnand %p987_p1, %p1590_p4  ;;  %s236_s20 = sshll.u32 %s1254_s19, 4  ;;  %s237_s20 = int_to_ptr.vmem [resolvable:$true] %s236_s20 }
  0x1b   : > { %p1087_p3 = scmp.ne.s32.totalorder %s221_s17, %s1086_s21  ;;  %p1094_p9 = scmp.lt.s32.totalorder %s221_s17, %s221_s17 }
  0x1c   : > { %p1077_p0 = pneg %p1374_p2  ;;  %p1095_p10 = scmp.lt.s32.totalorder %s1086_s21, %s1086_s21 }
  0x1e   : > { %p1089_p7 = pnand %p1087_p3, %p1077_p0  ;;  %p1096_p12 = por %p1095_p10, %p1094_p9 }
  0x20   : > { %p1090_p8 = pneg %p1089_p7 }
  0x22   : > { %p1097_p1 = pnand %p1096_p12, %p1090_p8 }
  0x24   : > { %1100 = shalt.err (!%p1097_p1)
}
  0x25   : > { %s1255_s22 = smov 64   ;;  %s1256_s23 = smov 4  }
  0x26   : > { %s1600_s1 = sld [smem:[#allocation15_spill]]  ;;  %s1112_s9 = scalar_lea.vmem %s237_s20, 1024 }
  0x27   : > { %p1113_p4 = scmp.ne.s32.totalorder %s237_s20, %s1112_s9  ;;  %p1120_p11 = scmp.lt.s32.totalorder %s237_s20, %s237_s20 }
  0x28   : > { %p1121_p6 = scmp.lt.s32.totalorder %s1112_s9, %s1112_s9 }
  0x29   : > { %p1115_p3 = pnand %p1113_p4, %p1077_p0 }
  0x2a   : > { %p1122_p9 = por %p1121_p6, %p1120_p11 }
  0x2b   : > { %p1116_p7 = pneg %p1115_p3 }
  0x2c   : > { %990 = dma.hbm_to_vmem [thread:$0]  (!%p1374_p2), %s1600_s1, 1024, %s221_s17, [#allocation6], %s1255_s22, %s1255_s22, %s1256_s23  }
  0x2d   : > { %p1123_p12 = pnand %p1122_p9, %p1116_p7 }
  0x2f   : > { %1126 = shalt.err (!%p1123_p12)
}
  0x30   : > { %s1601_s3 = sld [smem:[#allocation16_spill]]  ;;  %s1257_s21 = smov [#allocation8]  }
  0x31   : > { %s252_s17 = sshll.u32 %s1257_s21, 4  ;;  %s253_s17 = int_to_ptr.vmem [resolvable:$true] %s252_s17 }
  0x32   : > { %s1138_s29 = scalar_lea.vmem %s253_s17, 1024  ;;  %p1146_p1 = scmp.lt.s32.totalorder %s253_s17, %s253_s17 }
  0x33   : > { %p1139_p8 = scmp.ne.s32.totalorder %s253_s17, %s1138_s29  ;;  %p1147_p6 = scmp.lt.s32.totalorder %s1138_s29, %s1138_s29 }
  0x35   : > { %p1141_p4 = pnand %p1139_p8, %p1077_p0  ;;  %p1148_p11 = por %p1147_p6, %p1146_p1 }
  0x36   : > { %993 = dma.hbm_to_vmem [thread:$0]  (!%p1374_p2), %s1601_s3, 1024, %s237_s20, [#allocation6], %s1255_s22, %s1255_s22, %s1256_s23  }
  0x37   : > { %p1142_p10 = pneg %p1141_p4 }
  0x39   : > { %p1149_p3 = pnand %p1148_p11, %p1142_p10 }
  0x3b   : > { %1152 = shalt.err (!%p1149_p3)
}
  0x3c   : > { %996 = dma.hbm_to_vmem [thread:$0]  (!%p1374_p2), %s1587_s5, 1024, %s253_s17, [#allocation9], %s1255_s22, %s1255_s22, %s1256_s23  }
  0x3d   : > { %p834_p7 = scmp.ge.s32.totalorder %s1251_s27, 3 }
  0x3f   : > { %265 = sbr.rel (%p834_p7) target bundleno = 100 (0x64), region = 40 }
  0x44   : > { %268 = sbr.rel (!%p1345_p5) target bundleno = 100 (0x64), region = 44  ;;  %s269_s20 = sand.u32 (%p1345_p5), 1, %s1247_s26  }
  0x45   : > { %s836_s16 = sshll.u32 (%p1345_p5), %s1251_s27, 1  ;;  %s835_s19 = sshll.u32 (%p1345_p5), %s269_s20, 4 }
  0x46   : > { %s275_s21 = ssub.s32 (%p1345_p5), 5, %s836_s16  ;;  %s1412_s8 = scalar_lea.sflag (%p1345_p5), [#allocation3], %s269_s20 }
  0x47   : > { %p276_p0 = scmp.lt.s32.totalorder (%p1345_p5), %s275_s21, 2  ;;  %s273_s22 = scalar_lea.vmem (%p1345_p5), [#allocation2], %s835_s19 }
  0x49   : > { %s1614_s21 = smov (!%p276_p0, %s275_s21), 2 }
  0x4a   : > { %s1409_s29 = sshll.u32 %s1614_s21, 7 }
  0x4b   : > { %s280_s18 = ssub.s32 256, %s1409_s29 }
  0x4c   : > { %281 = vsyncadd %s1412_s8, %s280_s18  ;;  %p838_p5 = scmp.ne.s32.totalorder %s1409_s29, 0  ;;  %s884_s11 = sshll.u32 %s1251_s27, 8 }
  0x4d   : > { %s1420_s9 = scalar_lea.hbm %s1582_s0, %s884_s11  ;;  %s286_s16 = sshll.u32 %s273_s22, 4  ;;  %s1422_s16 = int_to_ptr.vmem [resolvable:$true] %s286_s16 }
  0x4e   : > { %s1153_s20 = scalar_lea.hbm %s1420_s9, %s1409_s29  ;;  %s1157_s18 = scalar_lea.hbm %s1582_s0, 640 }
  0x4f   : > { %p1154_p2 = scmp.ne.s32.totalorder %s1420_s9, %s1153_s20  ;;  %p1158_p8 = scmp.lt.s32.totalorder %s1420_s9, %s1582_s0 }
  0x50   : > { %p1159_p4 = scmp.lt.s32.totalorder %s1157_s18, %s1153_s20 }
  0x51   : > { %p1155_p9 = pnand %p1154_p2, %p838_p5 }
  0x52   : > { %p1160_p10 = por %p1159_p4, %p1158_p8 }
  0x53   : > { %p1156_p12 = pneg %p1155_p9 }
  0x55   : > { %p1161_p1 = pnand %p1160_p10, %p1156_p12 }
  0x57   : > { %1164 = shalt.err (!%p1161_p1)
}
  0x58   : > { %s1165_s22 = scalar_lea.vmem %s1422_s16, %s1409_s29  ;;  %s1258_s11 = smov [#allocation2]  }
  0x59   : > { %p1166_p6 = scmp.ne.s32.totalorder %s1422_s16, %s1165_s22  ;;  %s1169_s23 = sshll.u32 %s1258_s11, 4  ;;  %s1170_s23 = int_to_ptr.vmem [resolvable:$false] %s1169_s23 }
  0x5a   : > { %s1171_s17 = scalar_lea.vmem %s1170_s23, 512  ;;  %p1172_p7 = scmp.lt.s32.totalorder %s1422_s16, %s1170_s23 }
  0x5b   : > { %p1167_p11 = pnand %p1166_p6, %p838_p5  ;;  %p1173_p0 = scmp.lt.s32.totalorder %s1171_s17, %s1165_s22 }
  0x5d   : > { %p1168_p3 = pneg %p1167_p11  ;;  %p1174_p2 = por %p1173_p0, %p1172_p7 }
  0x5f   : > { %p1175_p9 = pnand %p1174_p2, %p1168_p3 }
  0x61   : > { %1178 = shalt.err (!%p1175_p9)
}
  0x62   : > { %s1259_s1 = smov 128   ;;  %s1260_s3 = smov 8  }
  0x63   : > { %292 = dma.hbm_to_vmem [thread:$0]  (%p838_p5), %s1420_s9, %s1409_s29, %s1422_s16, %s1412_s8, %s1259_s1, %s1259_s1, %s1260_s3  }
  0x64 PF: > { %298 = sbr.rel (%p1366_p13) target bundleno = 781 (0x30d), region = 48  ;;  %s1451_s20 = sand.u32 (!%p1366_p13), 1, %s1243_s25  }
  0x65   : > { %s843_s19 = sshll.u32 (!%p1366_p13), %s1451_s20, 4  ;;  %s301_s21 = scalar_lea.sflag (!%p1366_p13), [#allocation3], %s1451_s20 }
  0x66   : > { %s1457_s18 = scalar_lea.vmem (!%p1366_p13), [#allocation2], %s843_s19  ;;  %p1602_p12 = scmp.ne.s32.totalorder (!%p1366_p13), %s1595_s12, 0 }
  0x69   : > { %1222 = dma.done.wait (%p1602_p12), %s301_s21, 256  }
  0x6a   : > { %1224 = vsyncadd (%p1602_p12), %s301_s21, 4294967040  ;;  %p1603_p5 = scmp.eq.s32.totalorder %s1327_s28, 0 }
  0x6c   : > { %1226 = dma.done.wait (%p1603_p5), [#allocation6], 2048   ;;  %p1604_p13 = pmov %p1603_p5 }
  0x6d   : > { %p1605_p8 = pmov %p1603_p5 }
  0x6e   : > { %1228 = vsyncadd (%p1604_p13), [#allocation6], 4294965248 }
  0x6f   : > { %1230 = dma.done.wait (%p1605_p8), [#allocation9], 1024   ;;  %p1606_p4 = pmov %p1603_p5 }
  0x70   : > { %v1261_v0 = vmov 0.0   ;;  %vm1262_vm0 = vmmov 0   ;;  %v1051_v1 = vld [vmem:[#allocation5 + $0x38] sm:$0xff]   ;;  %v1052_v2 = vld [vmem:[#allocation5 + $0x30] sm:$0xff]   ;;  %v1053_v3 = vld [vmem:[#allocation5 + $0x28] sm:$0xff]   ;;  %s346_s22 = scalar_lea.vmem [#allocation10], %s843_s19 }
  0x71   : > { %1232 = vsyncadd (%p1606_p4), [#allocation9], 4294966272  ;;  %913 = vmatprep.subr.bf16.mxu0 %v1261_v0  ;;  %929 = vmatprep.mubr.msk.bf16.mxu0 %vm1262_vm0, %v1261_v0  ;;  %v1059_v4 = vld [vmem:[#allocation7 + $0x38] sm:$0xff]   ;;  %v1054_v5 = vld [vmem:[#allocation5 + $0x20] sm:$0xff]   ;;  %s708_s11 = scalar_lea.sflag [#allocation4], %s1451_s20  ;;  %p1607_p10 = scmp.ne.s32.totalorder %s1596_s13, 0 }
  0x72   : > { %933 = vmatprep.subr.bf16.mxu1 %v1261_v0  ;;  %949 = vmatprep.mubr.msk.bf16.mxu1 %vm1262_vm0, %v1261_v0  ;;  %v1060_v6 = vld [vmem:[#allocation7 + $0x30] sm:$0xff]   ;;  %v1055_v7 = vld [vmem:[#allocation5 + $0x18] sm:$0xff]   ;;  %v1061_v8 = vld [vmem:[#allocation7 + $0x28] sm:$0xff]   ;;  %s876_s23 = sshll.u32 (%p1607_p10), %s1327_s28, 1 }
  0x73   : > { %914 = vmatpush3.bf16.msra.mxu0 %v1051_v1  ;;  %934 = vmatpush3.bf16.msra.mxu1 %v1059_v4  ;;  %v1056_v9 = vld [vmem:[#allocation5 + $0x10] sm:$0xff]   ;;  %v1062_v10 = vld [vmem:[#allocation7 + $0x20] sm:$0xff]   ;;  %v1057_v11 = vld [vmem:[#allocation5 + $0x8] sm:$0xff]   ;;  %s716_s17 = ssub.s32 (%p1607_p10), 5, %s876_s23 }
  0x74   : > { %915 = vmatprep.subr.bf16.mxu0 %v1261_v0  ;;  %935 = vmatprep.subr.bf16.mxu1 %v1261_v0  ;;  %v1063_v12 = vld [vmem:[#allocation7 + $0x18] sm:$0xff]   ;;  %v1058_v13 = vld [vmem:[#allocation5] sm:$0xff]   ;;  %v1064_v17 = vld [vmem:[#allocation7 + $0x10] sm:$0xff]   ;;  %p717_p1 = scmp.lt.s32.totalorder (%p1607_p10), %s716_s17, 2 }
  0x75   : > { %v1488_v14 = vld [vmem:[%s1457_s18] sm:$0xff]  ;;  %v1491_v15 = vld [vmem:[%s1457_s18 + $0x8] sm:$0xff] }
  0x76   : > { %v360_v16 = vpack.c.bf16 %v1491_v15, %v1488_v14  ;;  %v1065_v18 = vld [vmem:[#allocation7 + $0x8] sm:$0xff]   ;;  %v1066_v19 = vld [vmem:[#allocation7] sm:$0xff]   ;;  %v1067_v20 = vld [vmem:[#allocation8 + $0x38] sm:$0xff]  }
  0x77   : > { %916 = vmatpush3.bf16.msra.mxu0 %v1052_v2  ;;  %936 = vmatpush3.bf16.msra.mxu1 %v1060_v6  ;;  %v1068_v21 = vld [vmem:[#allocation8 + $0x30] sm:$0xff]   ;;  %v1069_v22 = vld [vmem:[#allocation8 + $0x28] sm:$0xff]   ;;  %v1070_v23 = vld [vmem:[#allocation8 + $0x20] sm:$0xff]  }
  0x78   : > { %917 = vmatprep.subr.bf16.mxu0 %v1261_v0  ;;  %937 = vmatprep.subr.bf16.mxu1 %v1261_v0  ;;  %v1071_v24 = vld [vmem:[#allocation8 + $0x18] sm:$0xff]   ;;  %v848_v25 = vld [vmem:[%s1584_s2] ss:$0 sm:$0xff]  ;;  %v1072_v35 = vld [vmem:[#allocation8 + $0x10] sm:$0xff]  }
  0x79   : > { %v1073_v36 = vld [vmem:[#allocation8 + $0x8] sm:$0xff]   ;;  %v1074_v37 = vld [vmem:[#allocation8] sm:$0xff]  }
  0x7a   : > { %v857_v38 = vld [vmem:[%s1586_s4] ss:$0 sm:$0xff] }
  0x7b   : > { %918 = vmatpush3.bf16.msra.mxu0 %v1053_v3  ;;  %938 = vmatpush3.bf16.msra.mxu1 %v1061_v8  ;;  %v866_v48 = vld [vmem:[%s1588_s6] ss:$0 sm:$0xff] }
  0x7c   : > { %919 = vmatprep.subr.bf16.mxu0 %v1261_v0  ;;  %939 = vmatprep.subr.bf16.mxu1 %v1261_v0 }
  0x7f   : > { %920 = vmatpush3.bf16.msra.mxu0 %v1054_v5  ;;  %940 = vmatpush3.bf16.msra.mxu1 %v1062_v10 }
  0x80   : > { %921 = vmatprep.subr.bf16.mxu0 %v1261_v0  ;;  %941 = vmatprep.subr.bf16.mxu1 %v1261_v0 }
  0x83   : > { %922 = vmatpush3.bf16.msra.mxu0 %v1055_v7  ;;  %942 = vmatpush3.bf16.msra.mxu1 %v1063_v12 }
  0x84   : > { %923 = vmatprep.subr.bf16.mxu0 %v1261_v0  ;;  %943 = vmatprep.subr.bf16.mxu1 %v1261_v0 }
  0x87   : > { %924 = vmatpush3.bf16.msra.mxu0 %v1056_v9  ;;  %944 = vmatpush3.bf16.msra.mxu1 %v1064_v17 }
  0x88   : > { %925 = vmatprep.subr.bf16.mxu0 %v1261_v0  ;;  %945 = vmatprep.subr.bf16.mxu1 %v1261_v0 }
  0x8b   : > { %926 = vmatpush3.bf16.msra.mxu0 %v1057_v11  ;;  %946 = vmatpush3.bf16.msra.mxu1 %v1065_v18 }
  0x8c   : > { %927 = vmatprep.subr.bf16.mxu0 %v1261_v0  ;;  %947 = vmatprep.subr.bf16.mxu1 %v1261_v0 }
  0x8f   : > { %928 = vmatpush3.bf16.msra.mxu0 %v1058_v13  ;;  %948 = vmatpush3.bf16.msra.mxu1 %v1066_v19 }
  0x90   : > { %953 = vmatprep.subr.bf16.mxu0 %v1261_v0 }
  0x92   : > { %930 = vmatmul.mubr.bf16.vlgmr.msra.gmra.mxu0 %v360_v16 }
  0x93   : > { %969 = vmatprep.mubr.msk.bf16.mxu0 %vm1262_vm0, %v1261_v0  ;;  %954 = vmatpush3.bf16.msra.mxu0 %v1067_v20 }
  0x94   : > { %955 = vmatprep.subr.bf16.mxu0 %v1261_v0 }
  0x97   : > { %956 = vmatpush3.bf16.msra.mxu0 %v1068_v21 }
  0x98   : > { %957 = vmatprep.subr.bf16.mxu0 %v1261_v0 }
  0x9b   : > { %958 = vmatpush3.bf16.msra.mxu0 %v1069_v22 }
  0x9c   : > { %959 = vmatprep.subr.bf16.mxu0 %v1261_v0 }
  0x9f   : > { %960 = vmatpush3.bf16.msra.mxu0 %v1070_v23 }
  0xa0   : > { %961 = vmatprep.subr.bf16.mxu0 %v1261_v0 }
  0xa3   : > { %962 = vmatpush3.bf16.msra.mxu0 %v1071_v24 }
  0xa4   : > { %963 = vmatprep.subr.bf16.mxu0 %v1261_v0 }
  0xa7   : > { %964 = vmatpush3.bf16.msra.mxu0 %v1072_v35 }
  0xa8   : > { %965 = vmatprep.subr.bf16.mxu0 %v1261_v0 }
  0xab   : > { %966 = vmatpush3.bf16.msra.mxu0 %v1073_v36 }
  0xac   : > { %967 = vmatprep.subr.bf16.mxu0 %v1261_v0 }
  0xaf   : > { %968 = vmatpush3.bf16.msra.mxu0 %v1074_v37 }
 0x152   : > { %v466_v26 = vpop.f32.mrf.mxu0 }
 0x153   : > { %v467_v28 = vadd.f32 %v848_v25, %v466_v26 }
 0x154   : > { %v931_v27 = vpop.f32.mrf.mxu0 }
 0x155   : > { %v473_v32 = vmax.f32 %v467_v28, 0.0 }
 0x156   : > { %v469_v29 = vpop.f32.mrf.mxu0 }
 0x157   : > { %v470_v30 = vadd.f32 %v848_v25, %v469_v29 }
 0x158   : > { %v932_v31 = vpop.f32.mrf.mxu0 }
 0x159   : > { %v474_v33 = vmax.f32 %v470_v30, 0.0 }
 0x15b   : > { %v475_v34 = vpack.c.bf16 %v474_v33, %v473_v32 }
 0x15d   : > { %950 = vmatmul.mubr.bf16.vlgmr.msra.gmra.mxu1 %v475_v34 }
 0x21d   : > { %v581_v39 = vpop.f32.mrf.mxu1 }
 0x21e   : > { %v582_v41 = vadd.f32 %v857_v38, %v581_v39 }
 0x21f   : > { %v951_v40 = vpop.f32.mrf.mxu1 }
 0x220   : > { %v588_v45 = vmax.f32 %v582_v41, 0.0 }
 0x221   : > { %v584_v42 = vpop.f32.mrf.mxu1 }
 0x222   : > { %v585_v43 = vadd.f32 %v857_v38, %v584_v42 }
 0x223   : > { %v952_v44 = vpop.f32.mrf.mxu1 }
 0x224   : > { %v589_v46 = vmax.f32 %v585_v43, 0.0 }
 0x226   : > { %v590_v47 = vpack.c.bf16 %v589_v46, %v588_v45 }
 0x228   : > { %970 = vmatmul.mubr.bf16.vlgmr.msra.gmra.mxu0 %v590_v47 }
 0x2e8   : > { %v696_v49 = vpop.f32.mrf.mxu0 }
 0x2e9   : > { %v697_v50 = vadd.f32 %v866_v48, %v696_v49 }
 0x2ea   : > { %v971_v51 = vpop.f32.mrf.mxu0 }
 0x2eb   : > { %v703_v52 = vadd.f32 %v697_v50, %v1488_v14 }
 0x2ec   : > { %v699_v53 = vpop.f32.mrf.mxu0 }
 0x2ed   : > { %705 = vst [vmem:[%s346_s22] sm:$0xff] %v703_v52  ;;  %v700_v54 = vadd.f32 %v866_v48, %v699_v53  ;;  %714 = sbr.rel (!%p1607_p10) target bundleno = 781 (0x30d), region = 68 }
 0x2ee   : > { %v972_v55 = vpop.f32.mrf.mxu0 }
 0x2ef   : > { %v704_v56 = vadd.f32 %v700_v54, %v1491_v15 }
 0x2f1   : > { %706 = vst [vmem:[%s346_s22 + $0x8] sm:$0xff] %v704_v56 }
 0x2f2   : > { %s1616_s17 = smov (!%p717_p1, %s716_s17), 2 }
 0x2f3   : > { %s1526_s1 = sshll.u32 %s1616_s17, 7 }
 0x2f4   : > { %s721_s3 = ssub.s32 256, %s1526_s1 }
 0x2f5   : > { %722 = vsyncadd %s708_s11, %s721_s3  ;;  %p878_p6 = scmp.ne.s32.totalorder %s1526_s1, 0  ;;  %s885_s19 = sshll.u32 %s1327_s28, 8 }
 0x2f6   : > { %s1536_s18 = scalar_lea.hbm %s1589_s7, %s885_s19  ;;  %s727_s12 = sshll.u32 %s346_s22, 4  ;;  %s1538_s12 = int_to_ptr.vmem [resolvable:$true] %s727_s12 }
 0x2f7   : > { %s1179_s15 = scalar_lea.vmem %s1538_s12, %s1526_s1  ;;  %s1263_s29 = smov [#allocation10]  }
 0x2f8   : > { %p1180_p11 = scmp.ne.s32.totalorder %s1538_s12, %s1179_s15  ;;  %s1183_s8 = sshll.u32 %s1263_s29, 4  ;;  %s1184_s8 = int_to_ptr.vmem [resolvable:$false] %s1183_s8 }
 0x2f9   : > { %s1185_s28 = scalar_lea.vmem %s1184_s8, 512  ;;  %p1186_p0 = scmp.lt.s32.totalorder %s1538_s12, %s1184_s8 }
 0x2fa   : > { %p1181_p3 = pnand %p1180_p11, %p878_p6  ;;  %p1187_p2 = scmp.lt.s32.totalorder %s1185_s28, %s1179_s15 }
 0x2fc   : > { %p1182_p7 = pneg %p1181_p3  ;;  %p1188_p9 = por %p1187_p2, %p1186_p0 }
 0x2fe   : > { %p1189_p12 = pnand %p1188_p9, %p1182_p7 }
 0x300   : > { %1192 = shalt.err (!%p1189_p12)
}
 0x301   : > { %s1193_s9 = scalar_lea.hbm %s1536_s18, %s1526_s1  ;;  %s1197_s23 = scalar_lea.hbm %s1589_s7, 640 }
 0x302   : > { %p1194_p5 = scmp.ne.s32.totalorder %s1536_s18, %s1193_s9  ;;  %p1198_p4 = scmp.lt.s32.totalorder %s1536_s18, %s1589_s7 }
 0x303   : > { %p1199_p10 = scmp.lt.s32.totalorder %s1197_s23, %s1193_s9 }
 0x304   : > { %p1195_p13 = pnand %p1194_p5, %p878_p6 }
 0x305   : > { %p1200_p1 = por %p1199_p10, %p1198_p4 }
 0x306   : > { %p1196_p8 = pneg %p1195_p13 }
 0x308   : > { %p1201_p11 = pnand %p1200_p1, %p1196_p8 }
 0x30a   : > { %1204 = shalt.err (!%p1201_p11)
}
 0x30b   : > { %s1264_s19 = smov 128   ;;  %s1265_s13 = smov 8  }
 0x30c   : > { %733 = dma.vmem_to_hbm [thread:$0]  (%p878_p6), %s1538_s12, %s1526_s1, %s1536_s18, %s708_s11, %s1264_s19, %s1264_s19, %s1265_s13  }
 0x30d PF: > { %p1007_p3 = scmp.ge.s32.totalorder %s1251_s27, 2  ;;  %s742_s21 = sand.u32 1, %s1239_s24  }
 0x30e   : > { %p1608_p7 = scmp.ne.s32.totalorder %s1597_s14, 0  ;;  %s743_s15 = scalar_lea.sflag [#allocation4], %s742_s21 }
 0x310   : > { %p998_p0 = pnand %p1007_p3, %p1608_p7 }
 0x312   : > { %p999_p2 = pneg %p998_p0 }
 0x314   : > { %1234 = dma.done.wait (%p999_p2), %s743_s15, 256  }
 0x315   : > { %1236 = vsyncadd (%p999_p2), %s743_s15, 4294967040  ;;  %p22_p9 = scmp.ge.s32.totalorder %s1331_s30, 5   ;;  %s1609_s24 = smov %s1243_s25 }
 0x316   : > { %s1610_s25 = smov %s1247_s26  ;;  %s1611_s26 = smov %s1343_s10 }
 0x317   : > { %s1612_s27 = smov %s1331_s30  ;;  %24 = sbr.rel (!%p22_p9) target bundleno = 10 (0xa), region = 105 }
 0x31c   :  { %748 = vsyncpa [#allocation3], 1 }
 0x31d   :  { %750 = vsyncpa [#allocation3 + $0x1], 1 }
 0x31e   :  { %751 = vsyncpa [#allocation6], 1 }
 0x31f   :  { %752 = vsyncpa [#allocation9], 1 }
 0x320   :  { %753 = vsyncpa [#allocation4], 1 }
 0x321   :  { %755 = vsyncpa [#allocation4 + $0x1], 1 }

</bundles_post_ra>
